<compile_context>
chip_gen: v6e
topology: v6e:2x2x1
jax: 0.10.0
libtpu: 0.0.40
codegen_flags: <defaults>
</compile_context>

<pallas_src>
import jax
import jax.numpy as jnp
from jax.experimental import pallas as pl
from jax.experimental.pallas import tpu as pltpu

EPS = 1e-5  # nn.BatchNorm2d default eps


def _full_spec(shape):
    nd = len(shape)
    return pl.BlockSpec(shape, lambda i, _nd=nd: (0,) * _nd)


def _make_fused_kernel(K2, Cin, Cout, M, Q):
    inv_m = 1.0 / float(M)

    def kernel(xs_ref, wdw_ref, gd_ref, bd_ref, wpw_ref, gp_ref, bp_ref, o_ref):
        # xs_ref : (K2, Cin, M)  pre-shifted depthwise taps; M = 4*Q positions
        #                        ordered (dh, dw, n, h2, w2) along the lane axis
        # wdw_ref: (Cin, K2)     depthwise weights (one column per tap)
        # wpw_ref: (Cout, Cin)   pointwise weights
        # gd/bd  : (Cin, 1), gp/bp : (Cout, 1)   BN affine params
        # o_ref  : (Cout, Q)     pooled output (lane-dense, (8,128)-aligned)

        # ---- depthwise conv: K2 aligned VPU FMAs (windows pre-shifted by wrapper) ----
        wdw = wdw_ref[...]
        acc = xs_ref[0] * wdw[:, 0:1]
        for k in range(1, K2):
            acc = acc + xs_ref[k] * wdw[:, k:k + 1]           # (Cin, M)

        # ---- BN1 (training-mode batch stats, single pass) + ReLU, folded affine ----
        s1 = jnp.sum(acc, axis=1, keepdims=True)              # (Cin, 1)
        s2 = jnp.sum(acc * acc, axis=1, keepdims=True)
        mean1 = s1 * inv_m
        var1 = jnp.maximum(s2 * inv_m - mean1 * mean1, 0.0)   # biased var, clamped
        scale1 = gd_ref[...] * jax.lax.rsqrt(var1 + EPS)
        shift1 = bd_ref[...] - mean1 * scale1
        xd = jnp.maximum(acc * scale1 + shift1, 0.0)           # (Cin, M)

        # ---- pointwise 1x1 conv: Cin VPU MACs (contraction too small for the MXU) ----
        wpw = wpw_ref[...]
        z = wpw[:, 0:1] * xd[0:1, :]
        for c in range(1, Cin):
            z = z + wpw[:, c:c + 1] * xd[c:c + 1, :]           # (Cout, M)

        # ---- BN2 + ReLU ----
        t1 = jnp.sum(z, axis=1, keepdims=True)                 # (Cout, 1)
        t2 = jnp.sum(z * z, axis=1, keepdims=True)
        mean2 = t1 * inv_m
        var2 = jnp.maximum(t2 * inv_m - mean2 * mean2, 0.0)
        scale2 = gp_ref[...] * jax.lax.rsqrt(var2 + EPS)
        shift2 = bp_ref[...] - mean2 * scale2
        zp = jnp.maximum(z * scale2 + shift2, 0.0)              # (Cout, M)

        # ---- fused 2x2 max-pool: candidates are the four aligned Q-wide lane chunks ----
        p0 = jnp.maximum(zp[:, 0 * Q:1 * Q], zp[:, 1 * Q:2 * Q])
        p1 = jnp.maximum(zp[:, 2 * Q:3 * Q], zp[:, 3 * Q:4 * Q])
        o_ref[...] = jnp.maximum(p0, p1)                        # (Cout, Q)

    return kernel


def depth_sep_con_forward(x_nchw, w_dw, w_pw, gamma_d, beta_d, gamma_p, beta_p, Dk):
    """Forward of depthSepCon. x_nchw: (N, Cin, H, W) -> (N, Cout, H//2, W//2)."""
    N, Cin, H, W = x_nchw.shape
    Cout = w_pw.shape[0]
    assert Dk % 2 == 1, "padding=(Dk-1)/2 'same' conv requires odd Dk"
    assert H % 2 == 0 and W % 2 == 0, "2x2/2 max-pool requires even spatial dims"
    pad = (Dk - 1) // 2
    H2, W2 = H // 2, W // 2
    Q = N * H2 * W2          # pooled positions = output lane extent (128 here)
    M = 4 * Q                # = N*H*W pre-pool positions
    K2 = Dk * Dk

    # ---- wrapper-side layout plumbing only (no arithmetic) ----
    x = x_nchw.astype(jnp.float32)
    xp = jnp.pad(x, ((0, 0), (0, 0), (pad, pad), (pad, pad)))

    # im2col-lite with a pool-friendly lane order: each shifted window is laid out
    # as (Cin, dh, dw, n, h2, w2) flattened to (Cin, M) so the 2x2 pool partners
    # of a pooled position are the four aligned Q-wide chunks of the lane axis.
    taps = []
    for kh in range(Dk):
        for kw in range(Dk):
            win = xp[:, :, kh:kh + H, kw:kw + W]               # (N, Cin, H, W)
            win = win.reshape(N, Cin, H2, 2, W2, 2)            # (n, c, h2, dh, w2, dw)
            win = win.transpose(1, 3, 5, 0, 2, 4)              # (c, dh, dw, n, h2, w2)
            taps.append(win.reshape(Cin, M))
    xs = jnp.stack(taps, axis=0)                               # (K2, Cin, M)

    wdw = w_dw[:, 0, :, :].reshape(Cin, K2).astype(jnp.float32)   # (Cin, K2), tap k = kh*Dk+kw
    wpw = w_pw[:, :, 0, 0].astype(jnp.float32)                    # (Cout, Cin)
    gd = gamma_d.reshape(Cin, 1).astype(jnp.float32)
    bd = beta_d.reshape(Cin, 1).astype(jnp.float32)
    gp = gamma_p.reshape(Cout, 1).astype(jnp.float32)
    bp = beta_p.reshape(Cout, 1).astype(jnp.float32)

    kernel = _make_fused_kernel(K2, Cin, Cout, M, Q)
    # TODO(synk): training-mode BN needs global batch statistics, so this stays a
    # single grid step at these toy shapes; MobileNet-scale inputs need a tiled
    # two-pass (stats-accumulate / normalize) grid to bound VMEM (esp. 64 MiB v7x)
    # and enable DMA/compute pipelining + 'parallel' sharding across TensorCores.
    pooled = pl.pallas_call(
        kernel,
        out_shape=jax.ShapeDtypeStruct((Cout, Q), jnp.float32),
        grid=(1,),
        in_specs=[_full_spec(xs.shape), _full_spec(wdw.shape),
                  _full_spec(gd.shape), _full_spec(bd.shape),
                  _full_spec(wpw.shape), _full_spec(gp.shape), _full_spec(bp.shape)],
        out_specs=_full_spec((Cout, Q)),
        compiler_params=pltpu.CompilerParams(dimension_semantics=("arbitrary",)),
    )(xs, wdw, gd, bd, wpw, gp, bp)

    # (Cout, n*h2*w2) -> NCHW
    return pooled.reshape(Cout, N, H2, W2).transpose(1, 0, 2, 3)


def _reference_nchw(x, w_dw, w_pw, gd, bd, gp, bp, Dk):
    """Pure-JAX reference (two-pass BN, same training-mode semantics)."""
    N, Cin, H, W = x.shape
    Cout = w_pw.shape[0]
    pad = (Dk - 1) // 2
    xp = jnp.pad(x, ((0, 0), (0, 0), (pad, pad), (pad, pad)))
    acc = jnp.zeros((N, Cin, H, W), jnp.float32)
    for kh in range(Dk):
        for kw in range(Dk):
            acc = acc + xp[:, :, kh:kh + H, kw:kw + W] * w_dw[:, 0, kh, kw][None, :, None, None]
    m1 = acc.mean(axis=(0, 2, 3), keepdims=True)
    v1 = ((acc - m1) ** 2).mean(axis=(0, 2, 3), keepdims=True)
    xd = (acc - m1) * jax.lax.rsqrt(v1 + EPS)
    xd = jnp.maximum(xd * gd[None, :, None, None] + bd[None, :, None, None], 0.0)
    z = jnp.einsum('nchw,oc->nohw', xd, w_pw[:, :, 0, 0])
    m2 = z.mean(axis=(0, 2, 3), keepdims=True)
    v2 = ((z - m2) ** 2).mean(axis=(0, 2, 3), keepdims=True)
    zp = (z - m2) * jax.lax.rsqrt(v2 + EPS)
    zp = jnp.maximum(zp * gp[None, :, None, None] + bp[None, :, None, None], 0.0)
    return zp.reshape(N, Cout, H // 2, 2, W // 2, 2).max(axis=(3, 5))


if __name__ == "__main__":
    # Module config: depthSepCon(in_c=4, out_c=8, Dk=3); input (N=2, C=4, H=W=16)
    N, Cin, Cout, Dk, H, W = 2, 4, 8, 3, 16, 16

    key = jax.random.PRNGKey(0)
    kx, kdw, kpw = jax.random.split(key, 3)
    x_nchw = jax.random.normal(kx, (N, Cin, H, W), dtype=jnp.float32)

    # Deterministic parameter init (shapes from nn.Conv2d / nn.BatchNorm2d):
    w_dw = 0.2 * jax.random.normal(kdw, (Cin, 1, Dk, Dk), dtype=jnp.float32)   # depthwise
    w_pw = 0.2 * jax.random.normal(kpw, (Cout, Cin, 1, 1), dtype=jnp.float32)  # pointwise
    gamma_d = jnp.ones((Cin,), jnp.float32); beta_d = jnp.zeros((Cin,), jnp.float32)
    gamma_p = jnp.ones((Cout,), jnp.float32); beta_p = jnp.zeros((Cout,), jnp.float32)

    fwd = jax.jit(depth_sep_con_forward, static_argnums=7)
    out = jax.block_until_ready(
        fwd(x_nchw, w_dw, w_pw, gamma_d, beta_d, gamma_p, beta_p, Dk))
    assert out.shape == (N, Cout, H // 2, W // 2), out.shape

    ref = _reference_nchw(x_nchw, w_dw, w_pw, gamma_d, beta_d, gamma_p, beta_p, Dk)
    max_err = float(jnp.max(jnp.abs(out - ref)))
    assert jnp.allclose(out, ref, rtol=2e-4, atol=2e-4), max_err

    print("KERNEL_OK")
</pallas_src>

<mosaic_0001>
module attributes {stable_mosaic.version = 11 : i64} {
  func.func @kernel(%arg0: i32, %arg1: memref<9x4x512xf32, #tpu.memory_space<vmem>>, %arg2: memref<4x9xf32, #tpu.memory_space<vmem>>, %arg3: memref<4x1xf32, #tpu.memory_space<vmem>>, %arg4: memref<4x1xf32, #tpu.memory_space<vmem>>, %arg5: memref<8x4xf32, #tpu.memory_space<vmem>>, %arg6: memref<8x1xf32, #tpu.memory_space<vmem>>, %arg7: memref<8x1xf32, #tpu.memory_space<vmem>>, %arg8: memref<8x128xf32, #tpu.memory_space<vmem>>) attributes {dimension_semantics = [#tpu.dimension_semantics<arbitrary>], iteration_bounds = array<i64: 1>, scalar_prefetch = 0 : i64, scratch_operands = 0 : i64, tpu.core_type = #tpu.core_type<tc>, window_params = [{pipeline_mode = #tpu.pipeline_mode<synchronous>, transform_indices = @transform_0, window_bounds = array<i64: 9, 4, 512>}, {pipeline_mode = #tpu.pipeline_mode<synchronous>, transform_indices = @transform_1, window_bounds = array<i64: 4, 9>}, {pipeline_mode = #tpu.pipeline_mode<synchronous>, transform_indices = @transform_2, window_bounds = array<i64: 4, 1>}, {pipeline_mode = #tpu.pipeline_mode<synchronous>, transform_indices = @transform_3, window_bounds = array<i64: 4, 1>}, {pipeline_mode = #tpu.pipeline_mode<synchronous>, transform_indices = @transform_4, window_bounds = array<i64: 8, 4>}, {pipeline_mode = #tpu.pipeline_mode<synchronous>, transform_indices = @transform_5, window_bounds = array<i64: 8, 1>}, {pipeline_mode = #tpu.pipeline_mode<synchronous>, transform_indices = @transform_6, window_bounds = array<i64: 8, 1>}, {pipeline_mode = #tpu.pipeline_mode<synchronous>, transform_indices = @transform_7, window_bounds = array<i64: 8, 128>}]} {
    %c0 = arith.constant 0 : index
    %c0_0 = arith.constant 0 : index
    %0 = vector.load %arg2[%c0, %c0_0] : memref<4x9xf32, #tpu.memory_space<vmem>>, vector<4x9xf32>
    %c0_1 = arith.constant 0 : index
    %c0_2 = arith.constant 0 : index
    %c0_3 = arith.constant 0 : index
    %1 = vector.load %arg1[%c0_1, %c0_2, %c0_3] : memref<9x4x512xf32, #tpu.memory_space<vmem>>, vector<1x4x512xf32>
    %2 = vector.shape_cast %1 : vector<1x4x512xf32> to vector<4x512xf32>
    %3 = vector.extract_strided_slice %0 {offsets = [0, 0], sizes = [4, 1], strides = [1, 1]} : vector<4x9xf32> to vector<4x1xf32>
    %4 = vector.broadcast %3 : vector<4x1xf32> to vector<4x512xf32>
    %5 = arith.mulf %2, %4 : vector<4x512xf32>
    %c1 = arith.constant 1 : index
    %c0_4 = arith.constant 0 : index
    %c0_5 = arith.constant 0 : index
    %6 = vector.load %arg1[%c1, %c0_4, %c0_5] : memref<9x4x512xf32, #tpu.memory_space<vmem>>, vector<1x4x512xf32>
    %7 = vector.shape_cast %6 : vector<1x4x512xf32> to vector<4x512xf32>
    %8 = vector.extract_strided_slice %0 {offsets = [0, 1], sizes = [4, 1], strides = [1, 1]} : vector<4x9xf32> to vector<4x1xf32>
    %9 = vector.broadcast %8 : vector<4x1xf32> to vector<4x512xf32>
    %10 = arith.mulf %7, %9 : vector<4x512xf32>
    %11 = arith.addf %5, %10 : vector<4x512xf32>
    %c2 = arith.constant 2 : index
    %c0_6 = arith.constant 0 : index
    %c0_7 = arith.constant 0 : index
    %12 = vector.load %arg1[%c2, %c0_6, %c0_7] : memref<9x4x512xf32, #tpu.memory_space<vmem>>, vector<1x4x512xf32>
    %13 = vector.shape_cast %12 : vector<1x4x512xf32> to vector<4x512xf32>
    %14 = vector.extract_strided_slice %0 {offsets = [0, 2], sizes = [4, 1], strides = [1, 1]} : vector<4x9xf32> to vector<4x1xf32>
    %15 = vector.broadcast %14 : vector<4x1xf32> to vector<4x512xf32>
    %16 = arith.mulf %13, %15 : vector<4x512xf32>
    %17 = arith.addf %11, %16 : vector<4x512xf32>
    %c3 = arith.constant 3 : index
    %c0_8 = arith.constant 0 : index
    %c0_9 = arith.constant 0 : index
    %18 = vector.load %arg1[%c3, %c0_8, %c0_9] : memref<9x4x512xf32, #tpu.memory_space<vmem>>, vector<1x4x512xf32>
    %19 = vector.shape_cast %18 : vector<1x4x512xf32> to vector<4x512xf32>
    %20 = vector.extract_strided_slice %0 {offsets = [0, 3], sizes = [4, 1], strides = [1, 1]} : vector<4x9xf32> to vector<4x1xf32>
    %21 = vector.broadcast %20 : vector<4x1xf32> to vector<4x512xf32>
    %22 = arith.mulf %19, %21 : vector<4x512xf32>
    %23 = arith.addf %17, %22 : vector<4x512xf32>
    %c4 = arith.constant 4 : index
    %c0_10 = arith.constant 0 : index
    %c0_11 = arith.constant 0 : index
    %24 = vector.load %arg1[%c4, %c0_10, %c0_11] : memref<9x4x512xf32, #tpu.memory_space<vmem>>, vector<1x4x512xf32>
    %25 = vector.shape_cast %24 : vector<1x4x512xf32> to vector<4x512xf32>
    %26 = vector.extract_strided_slice %0 {offsets = [0, 4], sizes = [4, 1], strides = [1, 1]} : vector<4x9xf32> to vector<4x1xf32>
    %27 = vector.broadcast %26 : vector<4x1xf32> to vector<4x512xf32>
    %28 = arith.mulf %25, %27 : vector<4x512xf32>
    %29 = arith.addf %23, %28 : vector<4x512xf32>
    %c5 = arith.constant 5 : index
    %c0_12 = arith.constant 0 : index
    %c0_13 = arith.constant 0 : index
    %30 = vector.load %arg1[%c5, %c0_12, %c0_13] : memref<9x4x512xf32, #tpu.memory_space<vmem>>, vector<1x4x512xf32>
    %31 = vector.shape_cast %30 : vector<1x4x512xf32> to vector<4x512xf32>
    %32 = vector.extract_strided_slice %0 {offsets = [0, 5], sizes = [4, 1], strides = [1, 1]} : vector<4x9xf32> to vector<4x1xf32>
    %33 = vector.broadcast %32 : vector<4x1xf32> to vector<4x512xf32>
    %34 = arith.mulf %31, %33 : vector<4x512xf32>
    %35 = arith.addf %29, %34 : vector<4x512xf32>
    %c6 = arith.constant 6 : index
    %c0_14 = arith.constant 0 : index
    %c0_15 = arith.constant 0 : index
    %36 = vector.load %arg1[%c6, %c0_14, %c0_15] : memref<9x4x512xf32, #tpu.memory_space<vmem>>, vector<1x4x512xf32>
    %37 = vector.shape_cast %36 : vector<1x4x512xf32> to vector<4x512xf32>
    %38 = vector.extract_strided_slice %0 {offsets = [0, 6], sizes = [4, 1], strides = [1, 1]} : vector<4x9xf32> to vector<4x1xf32>
    %39 = vector.broadcast %38 : vector<4x1xf32> to vector<4x512xf32>
    %40 = arith.mulf %37, %39 : vector<4x512xf32>
    %41 = arith.addf %35, %40 : vector<4x512xf32>
    %c7 = arith.constant 7 : index
    %c0_16 = arith.constant 0 : index
    %c0_17 = arith.constant 0 : index
    %42 = vector.load %arg1[%c7, %c0_16, %c0_17] : memref<9x4x512xf32, #tpu.memory_space<vmem>>, vector<1x4x512xf32>
    %43 = vector.shape_cast %42 : vector<1x4x512xf32> to vector<4x512xf32>
    %44 = vector.extract_strided_slice %0 {offsets = [0, 7], sizes = [4, 1], strides = [1, 1]} : vector<4x9xf32> to vector<4x1xf32>
    %45 = vector.broadcast %44 : vector<4x1xf32> to vector<4x512xf32>
    %46 = arith.mulf %43, %45 : vector<4x512xf32>
    %47 = arith.addf %41, %46 : vector<4x512xf32>
    %c8 = arith.constant 8 : index
    %c0_18 = arith.constant 0 : index
    %c0_19 = arith.constant 0 : index
    %48 = vector.load %arg1[%c8, %c0_18, %c0_19] : memref<9x4x512xf32, #tpu.memory_space<vmem>>, vector<1x4x512xf32>
    %49 = vector.shape_cast %48 : vector<1x4x512xf32> to vector<4x512xf32>
    %50 = vector.extract_strided_slice %0 {offsets = [0, 8], sizes = [4, 1], strides = [1, 1]} : vector<4x9xf32> to vector<4x1xf32>
    %51 = vector.broadcast %50 : vector<4x1xf32> to vector<4x512xf32>
    %52 = arith.mulf %49, %51 : vector<4x512xf32>
    %53 = arith.addf %47, %52 : vector<4x512xf32>
    %cst = arith.constant dense<0.000000e+00> : vector<4xf32>
    %54 = vector.multi_reduction <add>, %53, %cst [1] : vector<4x512xf32> to vector<4xf32>
    %55 = vector.shape_cast %54 : vector<4xf32> to vector<4x1xf32>
    %56 = arith.mulf %53, %53 : vector<4x512xf32>
    %cst_20 = arith.constant dense<0.000000e+00> : vector<4xf32>
    %57 = vector.multi_reduction <add>, %56, %cst_20 [1] : vector<4x512xf32> to vector<4xf32>
    %58 = vector.shape_cast %57 : vector<4xf32> to vector<4x1xf32>
    %cst_21 = arith.constant 0.001953125 : f32
    %59 = vector.broadcast %cst_21 : f32 to vector<4x1xf32>
    %60 = arith.mulf %55, %59 : vector<4x1xf32>
    %cst_22 = arith.constant 0.001953125 : f32
    %61 = vector.broadcast %cst_22 : f32 to vector<4x1xf32>
    %62 = arith.mulf %58, %61 : vector<4x1xf32>
    %63 = arith.mulf %60, %60 : vector<4x1xf32>
    %64 = arith.subf %62, %63 : vector<4x1xf32>
    %cst_23 = arith.constant 0.000000e+00 : f32
    %65 = vector.broadcast %cst_23 : f32 to vector<4x1xf32>
    %66 = arith.maximumf %64, %65 : vector<4x1xf32>
    %c0_24 = arith.constant 0 : index
    %c0_25 = arith.constant 0 : index
    %67 = vector.load %arg3[%c0_24, %c0_25] : memref<4x1xf32, #tpu.memory_space<vmem>>, vector<4x1xf32>
    %cst_26 = arith.constant 9.99999974E-6 : f32
    %68 = vector.broadcast %cst_26 : f32 to vector<4x1xf32>
    %69 = arith.addf %66, %68 : vector<4x1xf32>
    %70 = math.rsqrt %69 : vector<4x1xf32>
    %71 = arith.mulf %67, %70 : vector<4x1xf32>
    %c0_27 = arith.constant 0 : index
    %c0_28 = arith.constant 0 : index
    %72 = vector.load %arg4[%c0_27, %c0_28] : memref<4x1xf32, #tpu.memory_space<vmem>>, vector<4x1xf32>
    %73 = arith.mulf %60, %71 : vector<4x1xf32>
    %74 = arith.subf %72, %73 : vector<4x1xf32>
    %75 = vector.broadcast %71 : vector<4x1xf32> to vector<4x512xf32>
    %76 = arith.mulf %53, %75 : vector<4x512xf32>
    %77 = vector.broadcast %74 : vector<4x1xf32> to vector<4x512xf32>
    %78 = arith.addf %76, %77 : vector<4x512xf32>
    %cst_29 = arith.constant 0.000000e+00 : f32
    %79 = vector.broadcast %cst_29 : f32 to vector<4x512xf32>
    %80 = arith.maximumf %78, %79 : vector<4x512xf32>
    %c0_30 = arith.constant 0 : index
    %c0_31 = arith.constant 0 : index
    %81 = vector.load %arg5[%c0_30, %c0_31] : memref<8x4xf32, #tpu.memory_space<vmem>>, vector<8x4xf32>
    %82 = vector.extract_strided_slice %81 {offsets = [0, 0], sizes = [8, 1], strides = [1, 1]} : vector<8x4xf32> to vector<8x1xf32>
    %83 = vector.extract_strided_slice %80 {offsets = [0, 0], sizes = [1, 512], strides = [1, 1]} : vector<4x512xf32> to vector<1x512xf32>
    %84 = vector.broadcast %82 : vector<8x1xf32> to vector<8x512xf32>
    %85 = vector.broadcast %83 : vector<1x512xf32> to vector<8x512xf32>
    %86 = arith.mulf %84, %85 : vector<8x512xf32>
    %87 = vector.extract_strided_slice %81 {offsets = [0, 1], sizes = [8, 1], strides = [1, 1]} : vector<8x4xf32> to vector<8x1xf32>
    %88 = vector.extract_strided_slice %80 {offsets = [1, 0], sizes = [1, 512], strides = [1, 1]} : vector<4x512xf32> to vector<1x512xf32>
    %89 = vector.broadcast %87 : vector<8x1xf32> to vector<8x512xf32>
    %90 = vector.broadcast %88 : vector<1x512xf32> to vector<8x512xf32>
    %91 = arith.mulf %89, %90 : vector<8x512xf32>
    %92 = arith.addf %86, %91 : vector<8x512xf32>
    %93 = vector.extract_strided_slice %81 {offsets = [0, 2], sizes = [8, 1], strides = [1, 1]} : vector<8x4xf32> to vector<8x1xf32>
    %94 = vector.extract_strided_slice %80 {offsets = [2, 0], sizes = [1, 512], strides = [1, 1]} : vector<4x512xf32> to vector<1x512xf32>
    %95 = vector.broadcast %93 : vector<8x1xf32> to vector<8x512xf32>
    %96 = vector.broadcast %94 : vector<1x512xf32> to vector<8x512xf32>
    %97 = arith.mulf %95, %96 : vector<8x512xf32>
    %98 = arith.addf %92, %97 : vector<8x512xf32>
    %99 = vector.extract_strided_slice %81 {offsets = [0, 3], sizes = [8, 1], strides = [1, 1]} : vector<8x4xf32> to vector<8x1xf32>
    %100 = vector.extract_strided_slice %80 {offsets = [3, 0], sizes = [1, 512], strides = [1, 1]} : vector<4x512xf32> to vector<1x512xf32>
    %101 = vector.broadcast %99 : vector<8x1xf32> to vector<8x512xf32>
    %102 = vector.broadcast %100 : vector<1x512xf32> to vector<8x512xf32>
    %103 = arith.mulf %101, %102 : vector<8x512xf32>
    %104 = arith.addf %98, %103 : vector<8x512xf32>
    %cst_32 = arith.constant dense<0.000000e+00> : vector<8xf32>
    %105 = vector.multi_reduction <add>, %104, %cst_32 [1] : vector<8x512xf32> to vector<8xf32>
    %106 = vector.shape_cast %105 : vector<8xf32> to vector<8x1xf32>
    %107 = arith.mulf %104, %104 : vector<8x512xf32>
    %cst_33 = arith.constant dense<0.000000e+00> : vector<8xf32>
    %108 = vector.multi_reduction <add>, %107, %cst_33 [1] : vector<8x512xf32> to vector<8xf32>
    %109 = vector.shape_cast %108 : vector<8xf32> to vector<8x1xf32>
    %cst_34 = arith.constant 0.001953125 : f32
    %110 = vector.broadcast %cst_34 : f32 to vector<8x1xf32>
    %111 = arith.mulf %106, %110 : vector<8x1xf32>
    %cst_35 = arith.constant 0.001953125 : f32
    %112 = vector.broadcast %cst_35 : f32 to vector<8x1xf32>
    %113 = arith.mulf %109, %112 : vector<8x1xf32>
    %114 = arith.mulf %111, %111 : vector<8x1xf32>
    %115 = arith.subf %113, %114 : vector<8x1xf32>
    %cst_36 = arith.constant 0.000000e+00 : f32
    %116 = vector.broadcast %cst_36 : f32 to vector<8x1xf32>
    %117 = arith.maximumf %115, %116 : vector<8x1xf32>
    %c0_37 = arith.constant 0 : index
    %c0_38 = arith.constant 0 : index
    %118 = vector.load %arg6[%c0_37, %c0_38] : memref<8x1xf32, #tpu.memory_space<vmem>>, vector<8x1xf32>
    %cst_39 = arith.constant 9.99999974E-6 : f32
    %119 = vector.broadcast %cst_39 : f32 to vector<8x1xf32>
    %120 = arith.addf %117, %119 : vector<8x1xf32>
    %121 = math.rsqrt %120 : vector<8x1xf32>
    %122 = arith.mulf %118, %121 : vector<8x1xf32>
    %c0_40 = arith.constant 0 : index
    %c0_41 = arith.constant 0 : index
    %123 = vector.load %arg7[%c0_40, %c0_41] : memref<8x1xf32, #tpu.memory_space<vmem>>, vector<8x1xf32>
    %124 = arith.mulf %111, %122 : vector<8x1xf32>
    %125 = arith.subf %123, %124 : vector<8x1xf32>
    %126 = vector.broadcast %122 : vector<8x1xf32> to vector<8x512xf32>
    %127 = arith.mulf %104, %126 : vector<8x512xf32>
    %128 = vector.broadcast %125 : vector<8x1xf32> to vector<8x512xf32>
    %129 = arith.addf %127, %128 : vector<8x512xf32>
    %cst_42 = arith.constant 0.000000e+00 : f32
    %130 = vector.broadcast %cst_42 : f32 to vector<8x512xf32>
    %131 = arith.maximumf %129, %130 : vector<8x512xf32>
    %132 = vector.extract_strided_slice %131 {offsets = [0, 0], sizes = [8, 128], strides = [1, 1]} : vector<8x512xf32> to vector<8x128xf32>
    %133 = vector.extract_strided_slice %131 {offsets = [0, 128], sizes = [8, 128], strides = [1, 1]} : vector<8x512xf32> to vector<8x128xf32>
    %134 = arith.maximumf %132, %133 : vector<8x128xf32>
    %135 = vector.extract_strided_slice %131 {offsets = [0, 256], sizes = [8, 128], strides = [1, 1]} : vector<8x512xf32> to vector<8x128xf32>
    %136 = vector.extract_strided_slice %131 {offsets = [0, 384], sizes = [8, 128], strides = [1, 1]} : vector<8x512xf32> to vector<8x128xf32>
    %137 = arith.maximumf %135, %136 : vector<8x128xf32>
    %138 = arith.maximumf %134, %137 : vector<8x128xf32>
    %c0_43 = arith.constant 0 : index
    %c0_44 = arith.constant 0 : index
    %139 = vector.load %arg8[%c0_43, %c0_44] : memref<8x128xf32, #tpu.memory_space<vmem>>, vector<8x128xf32>
    tpu.vector_store %arg8[%c0_43, %c0_44], %138 {strides = array<i32>} : memref<8x128xf32, #tpu.memory_space<vmem>>, vector<8x128xf32>,
    return
  }
  func.func @transform_0(%arg0: i32) -> (i32, i32, i32) {
    %c0_i32 = arith.constant 0 : i32
    %c0_i32_0 = arith.constant 0 : i32
    %c0_i32_1 = arith.constant 0 : i32
    %c0_i32_2 = arith.constant 0 : i32
    return %c0_i32, %c0_i32_0, %c0_i32_1 : i32, i32, i32
  }
  func.func @transform_1(%arg0: i32) -> (i32, i32) {
    %c0_i32 = arith.constant 0 : i32
    %c0_i32_0 = arith.constant 0 : i32
    %c0_i32_1 = arith.constant 0 : i32
    return %c0_i32, %c0_i32_0 : i32, i32
  }
  func.func @transform_2(%arg0: i32) -> (i32, i32) {
    %c0_i32 = arith.constant 0 : i32
    %c0_i32_0 = arith.constant 0 : i32
    %c0_i32_1 = arith.constant 0 : i32
    return %c0_i32, %c0_i32_0 : i32, i32
  }
  func.func @transform_3(%arg0: i32) -> (i32, i32) {
    %c0_i32 = arith.constant 0 : i32
    %c0_i32_0 = arith.constant 0 : i32
    %c0_i32_1 = arith.constant 0 : i32
    return %c0_i32, %c0_i32_0 : i32, i32
  }
  func.func @transform_4(%arg0: i32) -> (i32, i32) {
    %c0_i32 = arith.constant 0 : i32
    %c0_i32_0 = arith.constant 0 : i32
    %c0_i32_1 = arith.constant 0 : i32
    return %c0_i32, %c0_i32_0 : i32, i32
  }
  func.func @transform_5(%arg0: i32) -> (i32, i32) {
    %c0_i32 = arith.constant 0 : i32
    %c0_i32_0 = arith.constant 0 : i32
    %c0_i32_1 = arith.constant 0 : i32
    return %c0_i32, %c0_i32_0 : i32, i32
  }
  func.func @transform_6(%arg0: i32) -> (i32, i32) {
    %c0_i32 = arith.constant 0 : i32
    %c0_i32_0 = arith.constant 0 : i32
    %c0_i32_1 = arith.constant 0 : i32
    return %c0_i32, %c0_i32_0 : i32, i32
  }
  func.func @transform_7(%arg0: i32) -> (i32, i32) {
    %c0_i32 = arith.constant 0 : i32
    %c0_i32_0 = arith.constant 0 : i32
    %c0_i32_1 = arith.constant 0 : i32
    return %c0_i32, %c0_i32_0 : i32, i32
  }
}

</mosaic_0001>

<bundles_post_ra>
// kernel: depth_sep_con_forward.1
= control target key start
LH: loop header
LB: loop body
LE: loop exit
PB: predicated region body
PF: predicated region fallthrough
CT: control target
= control target key end

     0   :  { %v555_v0 = vmov 2   ;;  %v556_v1 = vmov 0   ;;  %v557_v3 = vmov 3   ;;  %v558_v4 = vmov 1   ;;  %s722_s1 = inlined_call_operand.vmem [shape: f32[4,9], index: 1, kind: input, shape index: {}]   ;;  %s723_s0 = inlined_call_operand.vmem [shape: f32[9,4,512], index: 0, kind: input, shape index: {}]   ;;  %s724_s2 = inlined_call_operand.vmem [shape: f32[4,1], index: 2, kind: input, shape index: {}]   ;;  %s725_s3 = inlined_call_operand.vmem [shape: f32[4,1], index: 3, kind: input, shape index: {}]   ;;  %s726_s4 = inlined_call_operand.vmem [shape: f32[8,4], index: 4, kind: input, shape index: {}]   ;;  %s727_s5 = inlined_call_operand.vmem [shape: f32[8,1], index: 5, kind: input, shape index: {}]   ;;  %s728_s6 = inlined_call_operand.vmem [shape: f32[8,1], index: 6, kind: input, shape index: {}]   ;;  %s729_s7 = inlined_call_operand.vmem [shape: f32[8,128], index: 7, kind: output, shape index: {}]  }
   0x1   :  { %538 = vset.pattern.permute.xlu1 %v555_v0  ;;  %536 = vset.pattern.permute.xlu0 %v556_v1  ;;  %v26_v2 = vld [vmem:[%s722_s1] sm:$0xf]  ;;  %v559_v5 = vmov 4   ;;  %v560_v6 = vmov 5   ;;  %v561_v7 = vmov 6   ;;  %v562_v8 = vmov 8  }
   0x2   :  { %65 = vperm.xlu1 %538, %v26_v2   ;;  %31 = vperm.xlu0 %536, %v26_v2   ;;  %v563_v9 = vmov 7   ;;  %v564_v10 = vmov 839922192   ;;  %v36_v12 = vlaneseq  ;;  %v27_v19 = vld [vmem:[%s723_s0] sm:$0xff]  ;;  %v28_v20 = vld [vmem:[%s723_s0 + $0x8] sm:$0xff]  ;;  %v510_v23 = vld [vmem:[%s723_s0 + $0x10] sm:$0xff] }
   0x3   :  { %v34_v11 = vunpack.c.l.s4 %v564_v10  ;;  %v511_v24 = vld [vmem:[%s723_s0 + $0x18] sm:$0xff]  ;;  %v512_v27 = vld [vmem:[%s723_s0 + $0x20] sm:$0xff]  ;;  %v513_v28 = vld [vmem:[%s723_s0 + $0x28] sm:$0xff]  ;;  %vm193_vm0 = vcmask 1043456  }
   0x4   :  { %v614_v14 = vshrl.u32 %v36_v12, 7  ;;  %v514_v34 = vld [vmem:[%s723_s0 + $0x30] sm:$0xff]  ;;  %v515_v35 = vld [vmem:[%s723_s0 + $0x38] sm:$0xff]  ;;  %v516_v41 = vld [vmem:[%s723_s0 + $0x40] sm:$0xff] }
   0x5   :  { %v35_v13 = vunpack.c.0.s8 %v34_v11  ;;  %v517_v42 = vld [vmem:[%s723_s0 + $0x48] sm:$0xff]  ;;  %v518_v50 = vld [vmem:[%s723_s0 + $0x50] sm:$0xff]  ;;  %v519_v51 = vld [vmem:[%s723_s0 + $0x58] sm:$0xff] }
   0x6   :  { %539 = vset.pattern.permute.xlu1 %v557_v3  ;;  %537 = vset.pattern.permute.xlu0 %v558_v4  ;;  %v520_v62 = vld [vmem:[%s723_s0 + $0x60] sm:$0xff]  ;;  %v521_v63 = vld [vmem:[%s723_s0 + $0x68] sm:$0xff] }
   0x7   :  { %83 = vperm.xlu1 %539, %v26_v2   ;;  %47 = vperm.xlu0 %537, %v26_v2   ;;  %v617_v17 = vsub.s32 %v35_v13, %v614_v14  ;;  %v524_v10 = vld [vmem:[%s723_s0 + $0x80] sm:$0xff]  ;;  %v525_v11 = vld [vmem:[%s723_s0 + $0x88] sm:$0xff]  ;;  %v522_v13 = vld [vmem:[%s723_s0 + $0x70] sm:$0xff] }
   0xb   :  { %540 = vset.pattern.permute.xlu1 %v559_v5  ;;  %541 = vset.pattern.permute.xlu0 %v560_v6 }
   0xc   :  { %101 = vperm.xlu1 %540, %v26_v2   ;;  %119 = vperm.xlu0 %541, %v26_v2  }
  0x10   :  { %542 = vset.pattern.permute.xlu1 %v561_v7  ;;  %544 = vset.pattern.permute.xlu0 %v562_v8 }
  0x11   :  { %137 = vperm.xlu1 %542, %v26_v2   ;;  %173 = vperm.xlu0 %544, %v26_v2  }
  0x15   :  { %543 = vset.pattern.permute.xlu1 %v563_v9  ;;  %546 = vset.pattern.permute.xlu0 %v556_v1 }
  0x16   :  { %155 = vperm.xlu1 %543, %v26_v2  }
  0x1a   :  { %545 = vset.pattern.permute.xlu1 %v556_v1 }
  0x7d   :  { %v66_v15 = vpop.permute.xlu1 %65  ;;  %v32_v16 = vpop.permute.xlu0 %31 }
  0x7e   :  { %v39_v18 = vrot.slane %v32_v16, %v617_v17  ;;  %v73_v25 = vrot.slane %v66_v15, %v617_v17  ;;  %v523_v15 = vld [vmem:[%s723_s0 + $0x78] sm:$0xff] }
  0x80   :  { %v41_v29 = vmul.f32 %v39_v18, %v27_v19  ;;  %v42_v30 = vmul.f32 %v39_v18, %v28_v20  ;;  %v75_v36 = vmul.f32 %v512_v27, %v73_v25  ;;  %v76_v37 = vmul.f32 %v513_v28, %v73_v25 }
  0x82   :  { %v84_v21 = vpop.permute.xlu1 %83  ;;  %v48_v22 = vpop.permute.xlu0 %47 }
  0x83   :  { %v55_v26 = vrot.slane %v48_v22, %v617_v17  ;;  %v91_v31 = vrot.slane %v84_v21, %v617_v17 }
  0x85   :  { %v57_v32 = vmul.f32 %v510_v23, %v55_v26  ;;  %v58_v33 = vmul.f32 %v511_v24, %v55_v26  ;;  %v93_v46 = vmul.f32 %v514_v34, %v91_v31  ;;  %v94_v47 = vmul.f32 %v515_v35, %v91_v31 }
  0x87   :  { %v59_v38 = vadd.f32 %v57_v32, %v41_v29  ;;  %v60_v39 = vadd.f32 %v58_v33, %v42_v30  ;;  %v102_v40 = vpop.permute.xlu1 %101  ;;  %v120_v43 = vpop.permute.xlu0 %119 }
  0x88   :  { %v109_v44 = vrot.slane %v102_v40, %v617_v17  ;;  %v127_v45 = vrot.slane %v120_v43, %v617_v17 }
  0x89   :  { %v77_v48 = vadd.f32 %v75_v36, %v59_v38  ;;  %v78_v49 = vadd.f32 %v76_v37, %v60_v39 }
  0x8a   :  { %v111_v52 = vmul.f32 %v516_v41, %v109_v44  ;;  %v112_v53 = vmul.f32 %v517_v42, %v109_v44  ;;  %v129_v56 = vmul.f32 %v518_v50, %v127_v45  ;;  %v130_v57 = vmul.f32 %v519_v51, %v127_v45 }
  0x8b   :  { %v95_v54 = vadd.f32 %v93_v46, %v77_v48  ;;  %v96_v55 = vadd.f32 %v94_v47, %v78_v49 }
  0x8c   :  { %v138_v58 = vpop.permute.xlu1 %137  ;;  %v174_v59 = vpop.permute.xlu0 %173 }
  0x8d   :  { %v113_v60 = vadd.f32 %v111_v52, %v95_v54  ;;  %v114_v61 = vadd.f32 %v112_v53, %v96_v55  ;;  %v145_v2 = vrot.slane %v138_v58, %v617_v17  ;;  %v181_v5 = vrot.slane %v174_v59, %v617_v17  ;;  %v229_v59 = vld [vmem:[%s725_s3] sm:$0xf] }
  0x8f   :  { %v131_v6 = vadd.f32 %v129_v56, %v113_v60  ;;  %v132_v7 = vadd.f32 %v130_v57, %v114_v61  ;;  %v147_v8 = vmul.f32 %v520_v62, %v145_v2  ;;  %v148_v9 = vmul.f32 %v521_v63, %v145_v2  ;;  %v225_v56 = vld [vmem:[%s724_s2] sm:$0xf] }
  0x90   :  { %v183_v18 = vmul.f32 %v524_v10, %v181_v5  ;;  %v184_v19 = vmul.f32 %v525_v11, %v181_v5  ;;  %v262_v61 = vld [vmem:[%s726_s4] sm:$0xff]  ;;  %v272_v11 = vsub.s32 0, %v614_v14 }
  0x91   :  { %v156_v12 = vpop.permute.xlu1 %155  ;;  %v149_v20 = vadd.f32 %v147_v8, %v131_v6  ;;  %v150_v21 = vadd.f32 %v148_v9, %v132_v7 }
  0x92   :  { %v163_v16 = vrot.slane %v156_v12, %v617_v17  ;;  %v320_v12 = vsub.s32 5, %v614_v14 }
  0x94   :  { %v165_v22 = vmul.f32 %v522_v13, %v163_v16  ;;  %v166_v23 = vmul.f32 %v523_v15, %v163_v16  ;;  %v364_v16 = vsub.s32 2, %v614_v14 }
  0x96   :  { %v167_v24 = vadd.f32 %v165_v22, %v149_v20  ;;  %v168_v25 = vadd.f32 %v166_v23, %v150_v21 }
  0x98   :  { %v185_v26 = vadd.f32 %v183_v18, %v167_v24  ;;  %v186_v27 = vadd.f32 %v184_v19, %v168_v25  ;;  %v368_v18 = vsub.s32 6, %v614_v14  ;;  %v412_v19 = vsub.s32 3, %v614_v14 }
  0x9a   :  { %v189_v28 = vcombine.high %v185_v26, %v185_v26  ;;  %v203_v29 = vmul.f32 %v185_v26, %v185_v26  ;;  %v204_v30 = vmul.f32 %v186_v27, %v186_v27  ;;  %v190_v31 = vcombine.high %v186_v27, %v186_v27 }
  0x9b   :  { %v194_v32 = vsel %vm193_vm0, %v185_v26, 0.0  ;;  %v197_v36 = vsel %vm193_vm0, %v186_v27, 0.0 }
  0x9c   :  { %v195_v33 = vsel %vm193_vm0, %v189_v28, 0.0  ;;  %v207_v35 = vcombine.high %v203_v29, %v203_v29  ;;  %v208_v38 = vcombine.high %v204_v30, %v204_v30  ;;  %v211_v39 = vsel %vm193_vm0, %v203_v29, 0.0 }
  0x9d   :  { %v196_v34 = vadd.f32 %v195_v33, %v194_v32  ;;  %v199_v41 = vsel %vm193_vm0, %v190_v31, 0.0  ;;  %v214_v44 = vsel %vm193_vm0, %v204_v30, 0.0 }
  0x9e   :  { %v212_v40 = vsel %vm193_vm0, %v207_v35, 0.0  ;;  %v216_v46 = vsel %vm193_vm0, %v208_v38, 0.0 }
  0x9f   :  { %v198_v37 = vadd.f32 %v197_v36, %v196_v34  ;;  %v213_v42 = vadd.f32 %v212_v40, %v211_v39 }
  0xa1   :  { %v200_v43 = vadd.f32 %v199_v41, %v198_v37  ;;  %v215_v45 = vadd.f32 %v214_v44, %v213_v42 }
  0xa3   :  { %201 = vadd.xlane.f32.xlu1 %v200_v43  ;;  %v217_v47 = vadd.f32 %v216_v46, %v215_v45 }
  0xa5   :  { %218 = vadd.xlane.f32.xlu0 %v217_v47 }
 0x12c   :  { %v202_v48 = vpop.xlane.xlu1 %201 }
 0x12d   :  { %v220_v49 = vmul.f32 0.001953125, %v202_v48 }
 0x12e   :  { %v219_v51 = vpop.xlane.xlu0 %218 }
 0x12f   :  { %v222_v50 = vmul.f32 %v220_v49, %v220_v49  ;;  %v221_v52 = vmul.f32 0.001953125, %v219_v51 }
 0x131   :  { %v223_v53 = vsub.f32 %v221_v52, %v222_v50 }
 0x133   :  { %v224_v54 = vmax.f32 %v223_v53, 0.0 }
 0x135   :  { %v226_v55 = vadd.f32 1e-05, %v224_v54 }
 0x137   :  { %551 = vrsqrt.f32 %v226_v55 }
 0x144   :  { %v552_v57 = vpop.eup %551 }
 0x145   :  { %v228_v58 = vmul.f32 %v552_v57, %v225_v56 }
 0x147   :  { %234 = vperm.xlu1 %545, %v228_v58   ;;  %v230_v60 = vmul.f32 %v228_v58, %v220_v49 }
 0x149   :  { %v231_v62 = vsub.f32 %v229_v59, %v230_v60 }
 0x14b   :  { %265 = vperm.xlu1 %545, %v262_v61   ;;  %248 = vperm.xlu0 %546, %v231_v62  }
 0x14f   :  { %547 = vset.pattern.permute.xlu1 %v558_v4 }
 0x150   :  { %311 = vperm.xlu1 %547, %v262_v61  }
 0x154   :  { %548 = vset.pattern.permute.xlu1 %v555_v0  ;;  %v276_v0 = vsub.s32 4, %v614_v14 }
 0x155   :  { %359 = vperm.xlu1 %548, %v262_v61  }
 0x159   :  { %549 = vset.pattern.permute.xlu1 %v557_v3  ;;  %v316_v3 = vsub.s32 1, %v614_v14 }
 0x15a   :  { %407 = vperm.xlu1 %549, %v262_v61  }
 0x15e   :  { %550 = vset.pattern.permute.xlu1 %v556_v1 }
 0x1c2   :  { %v235_v63 = vpop.permute.xlu1 %234 }
 0x1c3   :  { %v242_v2 = vrot.slane %v235_v63, %v617_v17 }
 0x1c5   :  { %v244_v7 = vmul.f32 %v242_v2, %v185_v26  ;;  %v245_v8 = vmul.f32 %v242_v2, %v186_v27 }
 0x1c6   :  { %v266_v5 = vpop.permute.xlu1 %265  ;;  %v249_v6 = vpop.permute.xlu0 %248 }
 0x1c7   :  { %v256_v9 = vrot.slane %v249_v6, %v617_v17  ;;  %v416_v17 = vsub.s32 7, %v614_v14 }
 0x1c9   :  { %v258_v10 = vadd.f32 %v256_v9, %v244_v7  ;;  %v259_v4 = vadd.f32 %v256_v9, %v245_v8 }
 0x1cb   :  { %v260_v1 = vmax.f32 %v258_v10, 0.0  ;;  %v261_v13 = vmax.f32 %v259_v4, 0.0  ;;  %v312_v15 = vpop.permute.xlu1 %311 }
 0x1cd   :  { %v273_v20 = vrot.slane %v260_v1, %v272_v11  ;;  %v277_v21 = vrot.slane %v260_v1, %v276_v0  ;;  %v281_v22 = vrot.slane %v261_v13, %v272_v11  ;;  %v285_v23 = vrot.slane %v261_v13, %v276_v0 }
 0x1ce   :  { %v317_v24 = vrot.slane %v260_v1, %v316_v3  ;;  %v321_v25 = vrot.slane %v260_v1, %v320_v12  ;;  %v325_v26 = vrot.slane %v261_v13, %v316_v3  ;;  %v329_v27 = vrot.slane %v261_v13, %v320_v12 }
 0x1cf   :  { %v293_v28 = vrot.slane %v273_v20, %v272_v11  ;;  %v297_v29 = vrot.slane %v277_v21, %v272_v11  ;;  %v301_v30 = vrot.slane %v281_v22, %v272_v11  ;;  %v305_v31 = vrot.slane %v285_v23, %v272_v11 }
 0x1d0   :  { %v337_v32 = vrot.slane %v317_v24, %v316_v3  ;;  %v341_v33 = vrot.slane %v321_v25, %v316_v3  ;;  %v345_v34 = vrot.slane %v325_v26, %v316_v3  ;;  %v349_v35 = vrot.slane %v329_v27, %v316_v3  ;;  %v360_v39 = vpop.permute.xlu1 %359 }
 0x1d1   :  { %v306_v36 = vmul.f32 %v293_v28, %v266_v5  ;;  %v307_v37 = vmul.f32 %v297_v29, %v266_v5  ;;  %v308_v38 = vmul.f32 %v301_v30, %v266_v5  ;;  %v309_v14 = vmul.f32 %v305_v31, %v266_v5 }
 0x1d2   :  { %v350_v40 = vmul.f32 %v337_v32, %v312_v15  ;;  %v351_v41 = vmul.f32 %v341_v33, %v312_v15  ;;  %v352_v42 = vmul.f32 %v345_v34, %v312_v15  ;;  %v353_v43 = vmul.f32 %v349_v35, %v312_v15 }
 0x1d3   :  { %v365_v44 = vrot.slane %v260_v1, %v364_v16  ;;  %v369_v45 = vrot.slane %v260_v1, %v368_v18  ;;  %v373_v46 = vrot.slane %v261_v13, %v364_v16  ;;  %v377_v47 = vrot.slane %v261_v13, %v368_v18 }
 0x1d4   :  { %v354_v48 = vadd.f32 %v350_v40, %v306_v36  ;;  %v355_v49 = vadd.f32 %v351_v41, %v307_v37  ;;  %v356_v50 = vadd.f32 %v352_v42, %v308_v38  ;;  %v357_v51 = vadd.f32 %v353_v43, %v309_v14  ;;  %v473_v36 = vld [vmem:[%s727_s5] sm:$0xff] }
 0x1d5   :  { %v385_v52 = vrot.slane %v365_v44, %v364_v16  ;;  %v389_v53 = vrot.slane %v369_v45, %v364_v16  ;;  %v393_v54 = vrot.slane %v373_v46, %v364_v16  ;;  %v397_v55 = vrot.slane %v377_v47, %v364_v16  ;;  %v408_v2 = vpop.permute.xlu1 %407  ;;  %v477_v14 = vld [vmem:[%s728_s6] sm:$0xff] }
 0x1d6   :  { %v413_v56 = vrot.slane %v260_v1, %v412_v19  ;;  %v417_v57 = vrot.slane %v260_v1, %v416_v17  ;;  %v421_v58 = vrot.slane %v261_v13, %v412_v19  ;;  %v425_v59 = vrot.slane %v261_v13, %v416_v17 }
 0x1d7   :  { %v398_v60 = vmul.f32 %v385_v52, %v360_v39  ;;  %v399_v61 = vmul.f32 %v389_v53, %v360_v39  ;;  %v400_v62 = vmul.f32 %v393_v54, %v360_v39  ;;  %v401_v63 = vmul.f32 %v397_v55, %v360_v39 }
 0x1d8   :  { %v433_v5 = vrot.slane %v413_v56, %v412_v19  ;;  %v437_v6 = vrot.slane %v417_v57, %v412_v19  ;;  %v441_v7 = vrot.slane %v421_v58, %v412_v19  ;;  %v445_v8 = vrot.slane %v425_v59, %v412_v19 }
 0x1d9   :  { %v402_v9 = vadd.f32 %v398_v60, %v354_v48  ;;  %v403_v10 = vadd.f32 %v399_v61, %v355_v49  ;;  %v404_v4 = vadd.f32 %v400_v62, %v356_v50  ;;  %v405_v11 = vadd.f32 %v401_v63, %v357_v51 }
 0x1da   :  { %v446_v0 = vmul.f32 %v433_v5, %v408_v2  ;;  %v447_v3 = vmul.f32 %v437_v6, %v408_v2  ;;  %v448_v12 = vmul.f32 %v441_v7, %v408_v2  ;;  %v449_v15 = vmul.f32 %v445_v8, %v408_v2 }
 0x1dc   :  { %v450_v1 = vadd.f32 %v446_v0, %v402_v9  ;;  %v451_v16 = vadd.f32 %v447_v3, %v403_v10  ;;  %v452_v13 = vadd.f32 %v448_v12, %v404_v4  ;;  %v453_v18 = vadd.f32 %v449_v15, %v405_v11 }
 0x1de   :  { %v454_v17 = vadd.f32 %v451_v16, %v450_v1  ;;  %v459_v20 = vmul.f32 %v450_v1, %v450_v1  ;;  %v460_v21 = vmul.f32 %v451_v16, %v451_v16  ;;  %v461_v23 = vmul.f32 %v452_v13, %v452_v13 }
 0x1df   :  { %v462_v19 = vmul.f32 %v453_v18, %v453_v18 }
 0x1e0   :  { %v455_v22 = vadd.f32 %v454_v17, %v452_v13  ;;  %v463_v24 = vadd.f32 %v460_v21, %v459_v20 }
 0x1e2   :  { %v456_v25 = vadd.f32 %v455_v22, %v453_v18  ;;  %v464_v26 = vadd.f32 %v463_v24, %v461_v23 }
 0x1e4   :  { %457 = vadd.xlane.f32.xlu1 %v456_v25  ;;  %v465_v27 = vadd.f32 %v464_v26, %v462_v19 }
 0x1e6   :  { %466 = vadd.xlane.f32.xlu0 %v465_v27 }
 0x26d   :  { %v458_v28 = vpop.xlane.xlu1 %457 }
 0x26e   :  { %v468_v29 = vmul.f32 0.001953125, %v458_v28 }
 0x26f   :  { %v467_v30 = vpop.xlane.xlu0 %466 }
 0x270   :  { %v470_v31 = vmul.f32 %v468_v29, %v468_v29  ;;  %v469_v32 = vmul.f32 0.001953125, %v467_v30 }
 0x272   :  { %v471_v33 = vsub.f32 %v469_v32, %v470_v31 }
 0x274   :  { %v472_v34 = vmax.f32 %v471_v33, 0.0 }
 0x276   :  { %v474_v35 = vadd.f32 1e-05, %v472_v34 }
 0x278   :  { %553 = vrsqrt.f32 %v474_v35 }
 0x285   :  { %v554_v37 = vpop.eup %553 }
 0x286   :  { %v476_v38 = vmul.f32 %v554_v37, %v473_v36 }
 0x288   :  { %482 = vperm.xlu1 %550, %v476_v38   ;;  %v478_v39 = vmul.f32 %v476_v38, %v468_v29 }
 0x28a   :  { %v479_v40 = vsub.f32 %v477_v14, %v478_v39 }
 0x28c   :  { %491 = vperm.xlu0 %546, %v479_v40  }
 0x303   :  { %v483_v41 = vpop.permute.xlu1 %482 }
 0x304   :  { %v485_v42 = vmul.f32 %v483_v41, %v450_v1  ;;  %v486_v43 = vmul.f32 %v483_v41, %v451_v16  ;;  %v487_v44 = vmul.f32 %v483_v41, %v452_v13  ;;  %v488_v45 = vmul.f32 %v483_v41, %v453_v18 }
 0x307   :  { %v492_v46 = vpop.permute.xlu0 %491 }
 0x308   :  { %v494_v47 = vadd.f32 %v492_v46, %v485_v42  ;;  %v495_v48 = vadd.f32 %v492_v46, %v486_v43  ;;  %v496_v49 = vadd.f32 %v492_v46, %v487_v44  ;;  %v497_v50 = vadd.f32 %v492_v46, %v488_v45 }
 0x30a   :  { %v498_v51 = vmax.f32 %v494_v47, 0.0  ;;  %v499_v52 = vmax.f32 %v495_v48, 0.0  ;;  %v500_v53 = vmax.f32 %v496_v49, 0.0  ;;  %v501_v54 = vmax.f32 %v497_v50, 0.0 }
 0x30c   :  { %v502_v55 = vmax.f32 %v498_v51, %v499_v52  ;;  %v503_v56 = vmax.f32 %v500_v53, %v501_v54 }
 0x30e   :  { %v504_v57 = vmax.f32 %v502_v55, %v503_v56 }
 0x310   :  { %505 = vst [vmem:[%s729_s7] sm:$0xff] %v504_v57 }

</bundles_post_ra>
